<compile_context>
chip_gen: v7x
topology: tpu7x:2x2x1
jax: 0.10.0
libtpu: 0.0.40
codegen_flags: <defaults>
</compile_context>

<pallas_src>
import functools

import jax
import jax.numpy as jnp
from jax.experimental import pallas as pl
from jax.experimental.pallas import tpu as pltpu


def _sdpa_kernel(q_ref, k_ref, v_ref, out_ref, attn_ref, logattn_ref,
                 *, inv_temperature):
    # Blocks: q (Bt, TQ, D), k (Bt, Lk, D), v (Bt, Lk, Dv).
    # Fold 1/temperature into q (trace-time constant -> one small mul).
    q = q_ref[...] * inv_temperature
    k = k_ref[...]
    v = v_ref[...]

    # Scores: batched contraction over the last dim of both operands.
    # No explicit transpose of k (avoids XLU vxpose + extra VMEM temporary).
    s = jnp.einsum("bqd,bkd->bqk", q, k,
                   preferred_element_type=jnp.float32)          # (Bt, TQ, Lk)

    # Numerically-stable log_softmax / softmax over the last axis (dim=2).
    m = jnp.max(s, axis=-1, keepdims=True)
    shifted = s - m
    denom = jnp.sum(jnp.exp(shifted), axis=-1, keepdims=True)
    log_attn = shifted - jnp.log(denom)
    # Write log_attn out before computing attn to bound live (TQ,Lk) arrays.
    logattn_ref[...] = log_attn.astype(logattn_ref.dtype)

    attn = jnp.exp(log_attn)          # == exp(shifted)/denom, no divide needed
    attn_ref[...] = attn.astype(attn_ref.dtype)

    # output = attn @ v   (batched, MXU, f32 accumulation)
    out = jnp.einsum("bqk,bkd->bqd", attn.astype(v.dtype), v,
                     preferred_element_type=jnp.float32)
    out_ref[...] = out.astype(out_ref.dtype)


def _pick_q_tile(lq, max_tile=512):
    """Largest query tile <= max_tile that divides Lq and respects sublane=8."""
    if lq <= max_tile:
        return lq
    for t in range(max_tile - (max_tile % 8), 7, -8):
        if lq % t == 0:
            return t
    return lq


def _pick_batch_tile(b, lq, lk, d, dv, tq, budget_bytes=8 << 20):
    """Largest batch tile whose double-buffered working set fits the budget."""
    per_batch = 4 * (tq * d + lk * d + lk * dv + tq * dv + 2 * tq * lk)
    per_batch *= 2  # double buffering
    bt = max(1, min(b, budget_bytes // max(per_batch, 1)))
    while b % bt:
        bt -= 1
    return bt


def scaled_dot_product_attention(q, k, v, temperature):
    """Pallas TPU implementation of ScaledDotProductAttention.forward."""
    B, Lq, D = q.shape
    _, Lk, Dk = k.shape
    _, _, Dv = v.shape
    assert D == Dk and k.shape[0] == B and v.shape[0] == B and v.shape[1] == Lk

    TQ = _pick_q_tile(Lq)
    Bt = _pick_batch_tile(B, Lq, Lk, D, Dv, TQ)
    grid = (B // Bt, Lq // TQ)

    kernel = functools.partial(_sdpa_kernel,
                               inv_temperature=1.0 / float(temperature))

    out_shapes = (
        jax.ShapeDtypeStruct((B, Lq, Dv), jnp.float32),   # output
        jax.ShapeDtypeStruct((B, Lq, Lk), jnp.float32),   # attn
        jax.ShapeDtypeStruct((B, Lq, Lk), jnp.float32),   # log_attn
    )

    cost = pl.CostEstimate(
        flops=2 * B * Lq * Lk * (D + Dv),
        transcendentals=2 * B * Lq * Lk + B * Lq,
        bytes_accessed=4 * (B * Lq * D + B * Lk * D + B * Lk * Dv
                            + B * Lq * Dv + 2 * B * Lq * Lk),
    )

    return pl.pallas_call(
        kernel,
        out_shape=out_shapes,
        grid_spec=pltpu.PrefetchScalarGridSpec(
            num_scalar_prefetch=0,
            grid=grid,
            in_specs=[
                pl.BlockSpec((Bt, TQ, D), lambda b, qi: (b, qi, 0)),
                pl.BlockSpec((Bt, Lk, D), lambda b, qi: (b, 0, 0)),
                pl.BlockSpec((Bt, Lk, Dv), lambda b, qi: (b, 0, 0)),
            ],
            out_specs=[
                pl.BlockSpec((Bt, TQ, Dv), lambda b, qi: (b, qi, 0)),
                pl.BlockSpec((Bt, TQ, Lk), lambda b, qi: (b, qi, 0)),
                pl.BlockSpec((Bt, TQ, Lk), lambda b, qi: (b, qi, 0)),
            ],
        ),
        compiler_params=pltpu.CompilerParams(
            dimension_semantics=("parallel", "parallel")),
        cost_estimate=cost,
    )(q, k, v)


def _reference(q, k, v, temperature):
    attn = jnp.einsum("bqd,bkd->bqk", q, k) / temperature
    log_attn = jax.nn.log_softmax(attn, axis=2)
    attn = jax.nn.softmax(attn, axis=2)
    out = jnp.einsum("bqk,bkd->bqd", attn, v)
    return out, attn, log_attn


if __name__ == "__main__":
    key = jax.random.PRNGKey(0)
    kq, kk, kv = jax.random.split(key, 3)

    B, Lq, Lk, D, Dv = 2, 8, 8, 32, 32
    temperature = float(jnp.sqrt(jnp.float32(D)))   # typical: sqrt(d_k)

    q = jax.random.normal(kq, (B, Lq, D), dtype=jnp.float32)
    k = jax.random.normal(kk, (B, Lk, D), dtype=jnp.float32)
    v = jax.random.normal(kv, (B, Lk, Dv), dtype=jnp.float32)

    out, attn, log_attn = scaled_dot_product_attention(q, k, v, temperature)
    jax.block_until_ready((out, attn, log_attn))

    # Sanity check against pure-JAX reference.
    ref_out, ref_attn, ref_log_attn = _reference(q, k, v, temperature)
    assert jnp.allclose(out, ref_out, atol=1e-5, rtol=1e-5)
    assert jnp.allclose(attn, ref_attn, atol=1e-5, rtol=1e-5)
    assert jnp.allclose(log_attn, ref_log_attn, atol=1e-5, rtol=1e-5)

    print("KERNEL_OK")
</pallas_src>

<mosaic_0001>
module attributes {stable_mosaic.version = 11 : i64} {
  func.func @_sdpa_kernel(%arg0: i32, %arg1: i32, %arg2: memref<2x8x32xf32, #tpu.memory_space<vmem>>, %arg3: memref<2x8x32xf32, #tpu.memory_space<vmem>>, %arg4: memref<2x8x32xf32, #tpu.memory_space<vmem>>, %arg5: memref<2x8x32xf32, #tpu.memory_space<vmem>>, %arg6: memref<2x8x8xf32, #tpu.memory_space<vmem>>, %arg7: memref<2x8x8xf32, #tpu.memory_space<vmem>>) attributes {dimension_semantics = [#tpu.dimension_semantics<parallel>, #tpu.dimension_semantics<parallel>], iteration_bounds = array<i64: 1, 1>, scalar_prefetch = 0 : i64, scratch_operands = 0 : i64, tpu.core_type = #tpu.core_type<tc>, window_params = [{transform_indices = @transform_0, window_bounds = array<i64: 2, 8, 32>}, {transform_indices = @transform_1, window_bounds = array<i64: 2, 8, 32>}, {transform_indices = @transform_2, window_bounds = array<i64: 2, 8, 32>}, {transform_indices = @transform_3, window_bounds = array<i64: 2, 8, 32>}, {transform_indices = @transform_4, window_bounds = array<i64: 2, 8, 8>}, {transform_indices = @transform_5, window_bounds = array<i64: 2, 8, 8>}]} {
    %c0 = arith.constant 0 : index
    %c0_0 = arith.constant 0 : index
    %c0_1 = arith.constant 0 : index
    %0 = vector.load %arg2[%c0, %c0_0, %c0_1] : memref<2x8x32xf32, #tpu.memory_space<vmem>>, vector<2x8x32xf32>
    %cst = arith.constant 0.176776692 : f32
    %1 = vector.broadcast %cst : f32 to vector<2x8x32xf32>
    %2 = arith.mulf %0, %1 : vector<2x8x32xf32>
    %c0_2 = arith.constant 0 : index
    %c0_3 = arith.constant 0 : index
    %c0_4 = arith.constant 0 : index
    %3 = vector.load %arg3[%c0_2, %c0_3, %c0_4] : memref<2x8x32xf32, #tpu.memory_space<vmem>>, vector<2x8x32xf32>
    %c0_5 = arith.constant 0 : index
    %c0_6 = arith.constant 0 : index
    %c0_7 = arith.constant 0 : index
    %4 = vector.load %arg4[%c0_5, %c0_6, %c0_7] : memref<2x8x32xf32, #tpu.memory_space<vmem>>, vector<2x8x32xf32>
    "tpu.trace_start"() <{level = 10 : i32, message = "bqd,bkd->bqk"}> : () -> ()
    %cst_8 = arith.constant dense<0.000000e+00> : vector<2x8x8xf32>
    %5 = tpu.matmul %2, %3, %cst_8 {dimension_numbers = #tpu.dot_dimension_numbers<[2], [2], [1], [1], [0, 0, 0, 1, 1, 1], [0], [0]>} : vector<2x8x32xf32>, vector<2x8x32xf32>, vector<2x8x8xf32> -> vector<2x8x8xf32>
    "tpu.trace_stop"() : () -> ()
    %cst_9 = arith.constant dense<0xFF800000> : vector<2x8xf32>
    %6 = vector.multi_reduction <maximumf>, %5, %cst_9 [2] : vector<2x8x8xf32> to vector<2x8xf32>
    %7 = vector.shape_cast %6 : vector<2x8xf32> to vector<2x8x1xf32>
    %8 = vector.broadcast %7 : vector<2x8x1xf32> to vector<2x8x8xf32>
    %9 = arith.subf %5, %8 : vector<2x8x8xf32>
    %10 = math.exp %9 : vector<2x8x8xf32>
    %cst_10 = arith.constant dense<0.000000e+00> : vector<2x8xf32>
    %11 = vector.multi_reduction <add>, %10, %cst_10 [2] : vector<2x8x8xf32> to vector<2x8xf32>
    %12 = vector.shape_cast %11 : vector<2x8xf32> to vector<2x8x1xf32>
    %13 = math.log %12 : vector<2x8x1xf32>
    %14 = vector.broadcast %13 : vector<2x8x1xf32> to vector<2x8x8xf32>
    %15 = arith.subf %9, %14 : vector<2x8x8xf32>
    %c0_11 = arith.constant 0 : index
    %c0_12 = arith.constant 0 : index
    %c0_13 = arith.constant 0 : index
    %16 = vector.load %arg7[%c0_11, %c0_12, %c0_13] : memref<2x8x8xf32, #tpu.memory_space<vmem>>, vector<2x8x8xf32>
    tpu.vector_store %arg7[%c0_11, %c0_12, %c0_13], %15 {strides = array<i32>} : memref<2x8x8xf32, #tpu.memory_space<vmem>>, vector<2x8x8xf32>,
    %17 = math.exp %15 : vector<2x8x8xf32>
    %c0_14 = arith.constant 0 : index
    %c0_15 = arith.constant 0 : index
    %c0_16 = arith.constant 0 : index
    %18 = vector.load %arg6[%c0_14, %c0_15, %c0_16] : memref<2x8x8xf32, #tpu.memory_space<vmem>>, vector<2x8x8xf32>
    tpu.vector_store %arg6[%c0_14, %c0_15, %c0_16], %17 {strides = array<i32>} : memref<2x8x8xf32, #tpu.memory_space<vmem>>, vector<2x8x8xf32>,
    "tpu.trace_start"() <{level = 10 : i32, message = "bqk,bkd->bqd"}> : () -> ()
    %cst_17 = arith.constant dense<0.000000e+00> : vector<2x8x32xf32>
    %19 = tpu.matmul %17, %4, %cst_17 {dimension_numbers = #tpu.dot_dimension_numbers<[2], [1], [1], [2], [0, 0, 0, 1, 1, 2], [0], [0]>} : vector<2x8x8xf32>, vector<2x8x32xf32>, vector<2x8x32xf32> -> vector<2x8x32xf32>
    "tpu.trace_stop"() : () -> ()
    %c0_18 = arith.constant 0 : index
    %c0_19 = arith.constant 0 : index
    %c0_20 = arith.constant 0 : index
    %20 = vector.load %arg5[%c0_18, %c0_19, %c0_20] : memref<2x8x32xf32, #tpu.memory_space<vmem>>, vector<2x8x32xf32>
    tpu.vector_store %arg5[%c0_18, %c0_19, %c0_20], %19 {strides = array<i32>} : memref<2x8x32xf32, #tpu.memory_space<vmem>>, vector<2x8x32xf32>,
    return
  }
  func.func @transform_0(%arg0: i32, %arg1: i32) -> (i32, i32, i32) {
    %c0_i32 = arith.constant 0 : i32
    %c0_i32_0 = arith.constant 0 : i32
    return %arg0, %arg1, %c0_i32 : i32, i32, i32
  }
  func.func @transform_1(%arg0: i32, %arg1: i32) -> (i32, i32, i32) {
    %c0_i32 = arith.constant 0 : i32
    %c0_i32_0 = arith.constant 0 : i32
    %c0_i32_1 = arith.constant 0 : i32
    return %arg0, %c0_i32, %c0_i32_0 : i32, i32, i32
  }
  func.func @transform_2(%arg0: i32, %arg1: i32) -> (i32, i32, i32) {
    %c0_i32 = arith.constant 0 : i32
    %c0_i32_0 = arith.constant 0 : i32
    %c0_i32_1 = arith.constant 0 : i32
    return %arg0, %c0_i32, %c0_i32_0 : i32, i32, i32
  }
  func.func @transform_3(%arg0: i32, %arg1: i32) -> (i32, i32, i32) {
    %c0_i32 = arith.constant 0 : i32
    %c0_i32_0 = arith.constant 0 : i32
    return %arg0, %arg1, %c0_i32 : i32, i32, i32
  }
  func.func @transform_4(%arg0: i32, %arg1: i32) -> (i32, i32, i32) {
    %c0_i32 = arith.constant 0 : i32
    %c0_i32_0 = arith.constant 0 : i32
    return %arg0, %arg1, %c0_i32 : i32, i32, i32
  }
  func.func @transform_5(%arg0: i32, %arg1: i32) -> (i32, i32, i32) {
    %c0_i32 = arith.constant 0 : i32
    %c0_i32_0 = arith.constant 0 : i32
    return %arg0, %arg1, %c0_i32 : i32, i32, i32
  }
}

</mosaic_0001>

<bundles_post_ra>
// kernel: tpu_custom_call.1
= control target key start
LH: loop header
LB: loop body
LE: loop exit
PB: predicated region body
PF: predicated region fallthrough
CT: control target
= control target key end

     0   :  { %11 = vsyncpa [#allocation3], 0  ;;  %s804_s0 = inlined_call_operand.hbm [shape: f32[2,8,32], index: 0, kind: input, shape index: {}]   ;;  %s805_s1 = inlined_call_operand.hbm [shape: f32[2,8,32], index: 1, kind: input, shape index: {}]   ;;  %s806_s2 = inlined_call_operand.hbm [shape: f32[2,8,32], index: 2, kind: input, shape index: {}]   ;;  %s807_s3 = inlined_call_operand.hbm [shape: f32[2,8,32], index: 3, kind: output, shape index: {0}]   ;;  %s808_s4 = inlined_call_operand.hbm [shape: f32[2,8,8], index: 4, kind: output, shape index: {1}]   ;;  %s809_s5 = inlined_call_operand.hbm [shape: f32[2,8,8], index: 5, kind: output, shape index: {2}]  }
   0x1   :  { %12 = vsyncpa [#allocation6], 0 }
   0x2   :  { %13 = vsyncpa [#allocation4], 0 }
   0x3   :  { %14 = vsyncpa [#allocation10], 0  ;;  %s647_s18 = smov [#allocation5]   ;;  %s648_s20 = smov [#allocation2]  }
   0x4   :  { %s32_s19 = sshll.u32 %s647_s18, 4  ;;  %s20_s21 = sshll.u32 %s648_s20, 4  ;;  %s33_s19 = int_to_ptr.vmem [resolvable:$true] %s32_s19  ;;  %s687_s21 = int_to_ptr.vmem [resolvable:$true] %s20_s21 }
   0x5   :  { %s507_s24 = scalar_lea.hbm %s805_s1, 256 }
   0x6   :  { %p508_p0 = scmp.ne.s32.totalorder %s805_s1, %s507_s24  ;;  %p511_p1 = scmp.lt.u32.totalorder %s507_s24, %s805_s1 }
   0x8   :  { %p513_p2 = pnand %p511_p1, %p508_p0 }
   0xa   :  { %516 = shalt.err (!%p513_p2)
}
   0xb   :  { %s517_s29 = scalar_lea.vmem %s33_s19, 256  ;;  %p522_p4 = scmp.lt.s32.totalorder %s33_s19, %s33_s19 }
   0xc   :  { %p518_p3 = scmp.ne.s32.totalorder %s33_s19, %s517_s29  ;;  %p523_p5 = scmp.lt.s32.totalorder %s517_s29, %s517_s29 }
   0xe   :  { %p524_p6 = por %p523_p5, %p522_p4 }
  0x10   :  { %p525_p7 = pnand %p524_p6, %p518_p3 }
  0x12   :  { %528 = shalt.err (!%p525_p7)
}
  0x13   :  { %s649_s30 = smov 128   ;;  %s650_s6 = smov 8  }
  0x14   :  { %38 = dma.hbm_to_vmem [thread:$0]  %s805_s1, 256, %s33_s19, [#allocation6], %s649_s30, %s649_s30, %s650_s6  }
  0x15   :  { %s529_s11 = scalar_lea.hbm %s804_s0, 256 }
  0x16   :  { %p530_p8 = scmp.ne.s32.totalorder %s804_s0, %s529_s11  ;;  %p533_p9 = scmp.lt.u32.totalorder %s529_s11, %s804_s0 }
  0x18   :  { %p535_p10 = pnand %p533_p9, %p530_p8 }
  0x1a   :  { %538 = shalt.err (!%p535_p10)
}
  0x1b   :  { %s539_s16 = scalar_lea.vmem %s687_s21, 256  ;;  %p544_p12 = scmp.lt.s32.totalorder %s687_s21, %s687_s21 }
  0x1c   :  { %p540_p11 = scmp.ne.s32.totalorder %s687_s21, %s539_s16  ;;  %p545_p13 = scmp.lt.s32.totalorder %s539_s16, %s539_s16 }
  0x1e   :  { %p546_p0 = por %p545_p13, %p544_p12 }
  0x20   :  { %p547_p1 = pnand %p546_p0, %p540_p11 }
  0x22   :  { %550 = shalt.err (!%p547_p1)
}
  0x23   :  { %26 = dma.hbm_to_vmem [thread:$0]  %s804_s0, 256, %s687_s21, [#allocation3], %s649_s30, %s649_s30, %s650_s6  }
  0x24   :  { %s651_s18 = smov [#allocation7]   ;;  %s551_s23 = scalar_lea.hbm %s806_s2, 256 }
  0x25   :  { %s44_s19 = sshll.u32 %s651_s18, 4  ;;  %p552_p2 = scmp.ne.s32.totalorder %s806_s2, %s551_s23  ;;  %s45_s19 = int_to_ptr.vmem [resolvable:$true] %s44_s19 }
  0x26   :  { %p555_p3 = scmp.lt.u32.totalorder %s551_s23, %s806_s2 }
  0x28   :  { %p557_p4 = pnand %p555_p3, %p552_p2 }
  0x2a   :  { %560 = shalt.err (!%p557_p4)
}
  0x2b   :  { %s561_s28 = scalar_lea.vmem %s45_s19, 256  ;;  %p566_p6 = scmp.lt.s32.totalorder %s45_s19, %s45_s19 }
  0x2c   :  { %p562_p5 = scmp.ne.s32.totalorder %s45_s19, %s561_s28  ;;  %p567_p7 = scmp.lt.s32.totalorder %s561_s28, %s561_s28 }
  0x2e   :  { %p568_p8 = por %p567_p7, %p566_p6 }
  0x30   :  { %p569_p9 = pnand %p568_p8, %p562_p5 }
  0x32   :  { %572 = shalt.err (!%p569_p9)
}
  0x33   :  { %50 = dma.hbm_to_vmem [thread:$0]  %s806_s2, 256, %s45_s19, [#allocation6], %s649_s30, %s649_s30, %s650_s6  }
  0x34   :  { %639 = dma.done.wait [#allocation3], 256  }
  0x35   :  { %640 = vsyncadd [#allocation3], 4294967040 }
  0x36   :  { %641 = dma.done.wait [#allocation6], 512  }
  0x37   :  { %642 = vsyncadd [#allocation6], 4294966784  ;;  %v652_v0 = vmov 0.0   ;;  %vm653_vm0 = vmmov 0   ;;  %vm68_vm1 = vcmask 261120   ;;  %v64_v1 = vld [vmem:[#allocation5] sm:$0xff] }
  0x38   :  { %465 = vmatprep.subr.mxu0 %v652_v0  ;;  %467 = vmatprep.mubr.msk.f32.mxu0 %vm653_vm0, %v652_v0  ;;  %v60_v2 = vld [vmem:[#allocation2] sm:$0xff]  ;;  %v65_v3 = vld [vmem:[#allocation5 + $0x8] sm:$0xff]  ;;  %v61_v5 = vld [vmem:[#allocation2 + $0x8] sm:$0xff]  ;;  %vm221_vm2 = vcmask 64512   ;;  %s654_s2 = smov [#allocation9]  }
  0x39   :  { %470 = vmatprep.subr.mxu1 %v652_v0  ;;  %472 = vmatprep.mubr.msk.f32.mxu1 %vm653_vm0, %v652_v0  ;;  %v62_v4 = vmul.f32 0.17677669, %v60_v2  ;;  %v63_v6 = vmul.f32 0.17677669, %v61_v5  ;;  %v66_v23 = vld [vmem:[#allocation7] sm:$0xff]  ;;  %v67_v24 = vld [vmem:[#allocation7 + $0x8] sm:$0xff] }
  0x3a   :  { %466 = vmatpush3.xpose.msk.msra.mxu0 %vm68_vm1, %v64_v1  ;;  %471 = vmatpush3.xpose.msk.msra.mxu1 %vm68_vm1, %v65_v3  ;;  %s419_s29 = sshll.u32 %s654_s2, 4  ;;  %s420_s29 = int_to_ptr.vmem [resolvable:$true] %s419_s29 }
  0x3b   :  { %475 = vmatprep.subr.mxu0 %v652_v0  ;;  %480 = vmatprep.subr.mxu1 %v652_v0  ;;  %s573_s7 = scalar_lea.vmem %s420_s29, 256  ;;  %p578_p11 = scmp.lt.s32.totalorder %s420_s29, %s420_s29 }
  0x3c   :  { %p574_p10 = scmp.ne.s32.totalorder %s420_s29, %s573_s7  ;;  %p579_p12 = scmp.lt.s32.totalorder %s573_s7, %s573_s7 }
  0x3d   :  { %468 = vmatmul.mubr.msk.f32.vlgmr.msra.gmra.mrb[0].mxu0 %vm68_vm1, %v62_v4  ;;  %473 = vmatmul.mubr.msk.f32.vlgmr.msra.gmra.mrb[0].mxu1 %vm68_vm1, %v63_v6 }
  0x3e   :  { %477 = vmatprep.mubr.msk.f32.mxu0 %vm653_vm0, %v652_v0  ;;  %482 = vmatprep.mubr.msk.f32.mxu1 %vm653_vm0, %v652_v0  ;;  %p580_p13 = por %p579_p12, %p578_p11 }
  0x3f   :  { %476 = vmatpush3.msra.mxu0 %v66_v23  ;;  %481 = vmatpush3.msra.mxu1 %v67_v24 }
  0x40   :  { %p581_p0 = pnand %p580_p13, %p574_p10 }
 0x110   :  { %v141_v7 = vpop.f32.mrb[0].mxu0  ;;  %v217_v8 = vpop.f32.mrb[0].mxu1 }
 0x111   :  { %v469_v9 = vpop.f32.mrb[1].mxu0  ;;  %v222_v10 = vsel %vm221_vm2, %v141_v7, -inf  ;;  %v474_v11 = vpop.f32.mrb[1].mxu1  ;;  %v225_v12 = vsel %vm221_vm2, %v217_v8, -inf }
 0x112   :  { %223 = vmax.xlane.f32.xlu0 %v222_v10 }
 0x116   :  { %226 = vmax.xlane.f32.xlu0 %v225_v12 }
 0x19f   :  { %v224_v13 = vpop.xlane.xlu0 %223 }
 0x1a0   :  { %v228_v14 = vsub.f32 %v141_v7, %v224_v13 }
 0x1a2   :  { %v230_v15 = vmul.f32 1.442695, %v228_v14 }
 0x1a3   :  { %v227_v16 = vpop.xlane.xlu0 %226 }
 0x1a4   :  { %495 = vpow2.f32 %v230_v15  ;;  %v229_v17 = vsub.f32 %v217_v8, %v227_v16 }
 0x1a6   :  { %v232_v18 = vmul.f32 1.442695, %v229_v17 }
 0x1a8   :  { %497 = vpow2.f32 %v232_v18 }
 0x1ae   :  { %v496_v19 = vpop.eup %495 }
 0x1af   :  { %v234_v20 = vsel %vm221_vm2, %v496_v19, 0.0 }
 0x1b0   :  { %235 = vadd.xlane.f32.xlu1 %v234_v20 }
 0x1b2   :  { %v498_v21 = vpop.eup %497 }
 0x1b3   :  { %v237_v22 = vsel %vm221_vm2, %v498_v21, 0.0 }
 0x1b4   :  { %238 = vadd.xlane.f32.xlu1 %v237_v22 }
 0x23d   :  { %v236_v25 = vpop.xlane.xlu1 %235 }
 0x23e   :  { %499 = vlog2.f32 %v236_v25 }
 0x241   :  { %v239_v26 = vpop.xlane.xlu1 %238 }
 0x242   :  { %501 = vlog2.f32 %v239_v26 }
 0x248   :  { %v500_v27 = vpop.eup %499 }
 0x249   :  { %v241_v28 = vmul.f32 0.6931472, %v500_v27 }
 0x24b   :  { %v244_v29 = vsub.f32 %v228_v14, %v241_v28 }
 0x24c   :  { %v502_v30 = vpop.eup %501 }
 0x24d   :  { %v248_v31 = vmul.f32 1.442695, %v244_v29  ;;  %246 = vst.msk [vmem:[#allocation11] sm:$0xff] %vm221_vm2, %v244_v29  ;;  %v243_v32 = vmul.f32 0.6931472, %v502_v30 }
 0x24f   :  { %503 = vpow2.f32 %v248_v31  ;;  %v245_v33 = vsub.f32 %v229_v17, %v243_v32 }
 0x251   :  { %v250_v34 = vmul.f32 1.442695, %v245_v33  ;;  %247 = vst.msk [vmem:[#allocation11 + $0x8] sm:$0xff] %vm221_vm2, %v245_v33 }
 0x253   :  { %505 = vpow2.f32 %v250_v34 }
 0x259   :  { %v504_v35 = vpop.eup %503 }
 0x25a   :  { %252 = vst.msk [vmem:[#allocation9] sm:$0xff] %vm221_vm2, %v504_v35  ;;  %478 = vmatmul.mubr.msk.f32.vlgmr.msra.gmra.mrb[2].mxu0 %vm221_vm2, %v504_v35 }
 0x25d   :  { %v506_v36 = vpop.eup %505 }
 0x25e   :  { %253 = vst.msk [vmem:[#allocation9 + $0x8] sm:$0xff] %vm221_vm2, %v506_v36  ;;  %483 = vmatmul.mubr.msk.f32.vlgmr.msra.gmra.mrb[2].mxu1 %vm221_vm2, %v506_v36 }
 0x25f   :  { %584 = shalt.err (!%p581_p0)
}
 0x260   :  { %s585_s10 = scalar_lea.hbm %s808_s4, 256 }
 0x261   :  { %p586_p1 = scmp.ne.s32.totalorder %s808_s4, %s585_s10  ;;  %p589_p2 = scmp.lt.u32.totalorder %s585_s10, %s808_s4 }
 0x263   :  { %p591_p3 = pnand %p589_p2, %p586_p1 }
 0x265   :  { %594 = shalt.err (!%p591_p3)
}
 0x266   :  { %425 = dma.vmem_to_hbm [thread:$0]  %s420_s29, 256, %s808_s4, [#allocation10], %s649_s30, %s649_s30, %s650_s6  }
 0x267   :  { %s655_s1 = smov [#allocation11]  }
 0x268   :  { %s431_s17 = sshll.u32 %s655_s1, 4  ;;  %s432_s17 = int_to_ptr.vmem [resolvable:$true] %s431_s17 }
 0x269   :  { %s595_s18 = scalar_lea.vmem %s432_s17, 256  ;;  %p600_p5 = scmp.lt.s32.totalorder %s432_s17, %s432_s17 }
 0x26a   :  { %p596_p4 = scmp.ne.s32.totalorder %s432_s17, %s595_s18  ;;  %p601_p6 = scmp.lt.s32.totalorder %s595_s18, %s595_s18 }
 0x26c   :  { %p602_p7 = por %p601_p6, %p600_p5 }
 0x26e   :  { %p603_p8 = pnand %p602_p7, %p596_p4 }
 0x270   :  { %606 = shalt.err (!%p603_p8)
}
 0x271   :  { %s607_s22 = scalar_lea.hbm %s809_s5, 256 }
 0x272   :  { %p608_p9 = scmp.ne.s32.totalorder %s809_s5, %s607_s22  ;;  %p611_p10 = scmp.lt.u32.totalorder %s607_s22, %s809_s5 }
 0x274   :  { %p613_p11 = pnand %p611_p10, %p608_p9 }
 0x276   :  { %616 = shalt.err (!%p613_p11)
}
 0x277   :  { %437 = dma.vmem_to_hbm [thread:$0]  %s432_s17, 256, %s809_s5, [#allocation10], %s649_s30, %s649_s30, %s650_s6  }
 0x278   :  { %s656_s28 = smov [#allocation8]  }
 0x279   :  { %s407_s0 = sshll.u32 %s656_s28, 4  ;;  %s408_s0 = int_to_ptr.vmem [resolvable:$true] %s407_s0 }
 0x27a   :  { %s617_s21 = scalar_lea.vmem %s408_s0, 256  ;;  %p622_p13 = scmp.lt.s32.totalorder %s408_s0, %s408_s0 }
 0x27b   :  { %p618_p12 = scmp.ne.s32.totalorder %s408_s0, %s617_s21  ;;  %p623_p0 = scmp.lt.s32.totalorder %s617_s21, %s617_s21 }
 0x27d   :  { %p624_p1 = por %p623_p0, %p622_p13 }
 0x27f   :  { %p625_p2 = pnand %p624_p1, %p618_p12 }
 0x32d   :  { %v323_v37 = vpop.f32.mrb[2].mxu0 }
 0x32e   :  { %400 = vst.msk [vmem:[#allocation8] sm:$0xff] %vm68_vm1, %v323_v37  ;;  %v479_v38 = vpop.f32.mrb[3].mxu0 }
 0x331   :  { %v396_v39 = vpop.f32.mrb[2].mxu1 }
 0x332   :  { %401 = vst.msk [vmem:[#allocation8 + $0x8] sm:$0xff] %vm68_vm1, %v396_v39  ;;  %v484_v40 = vpop.f32.mrb[3].mxu1 }
 0x333   :  { %628 = shalt.err (!%p625_p2)
}
 0x334   :  { %s629_s29 = scalar_lea.hbm %s807_s3, 256 }
 0x335   :  { %p630_p3 = scmp.ne.s32.totalorder %s807_s3, %s629_s29  ;;  %p633_p4 = scmp.lt.u32.totalorder %s629_s29, %s807_s3 }
 0x337   :  { %p635_p5 = pnand %p633_p4, %p630_p3 }
 0x339   :  { %638 = shalt.err (!%p635_p5)
}
 0x33a   :  { %413 = dma.vmem_to_hbm [thread:$0]  %s408_s0, 256, %s807_s3, [#allocation4], %s649_s30, %s649_s30, %s650_s6  }
 0x33b   :  { %643 = dma.done.wait [#allocation4], 256  }
 0x33c   :  { %644 = vsyncadd [#allocation4], 4294967040 }
 0x33d   :  { %645 = dma.done.wait [#allocation10], 512  }
 0x33e   :  { %646 = vsyncadd [#allocation10], 4294966784 }
 0x33f   :  { %447 = vsyncpa [#allocation3], 1 }
 0x340   :  { %448 = vsyncpa [#allocation6], 1 }
 0x341   :  { %449 = vsyncpa [#allocation4], 1 }
 0x342   :  { %450 = vsyncpa [#allocation10], 1 }

</bundles_post_ra>
